<compile_context>
chip_gen: v6e
topology: v6e:2x2x1
jax: 0.10.0
libtpu: 0.0.40
codegen_flags: <defaults>
</compile_context>

<pallas_src>
import jax
import jax.numpy as jnp
from jax.experimental import pallas as pl
from jax.experimental.pallas import tpu as pltpu


def _round_up(x, m):
    return (x + m - 1) // m * m


def dqn_kernel(x_ref, w1_ref, b1_ref, w2_ref, b2_ref, w3_ref, b3_ref,
               w4_ref, b4_ref, o_ref):
    # Matmuls hit the MXU with bf16 inputs / f32 accumulation; bias-add + ReLU
    # run on the VPU. All operands for this batch tile are VMEM-resident.
    h = jnp.dot(x_ref[...].astype(jnp.bfloat16), w1_ref[...],
                preferred_element_type=jnp.float32)
    h = jnp.maximum(h + b1_ref[...], 0.0).astype(jnp.bfloat16)

    h = jnp.dot(h, w2_ref[...], preferred_element_type=jnp.float32)
    h = jnp.maximum(h + b2_ref[...], 0.0).astype(jnp.bfloat16)

    h = jnp.dot(h, w3_ref[...], preferred_element_type=jnp.float32)
    h = jnp.maximum(h + b3_ref[...], 0.0).astype(jnp.bfloat16)

    h = jnp.dot(h, w4_ref[...], preferred_element_type=jnp.float32)
    o_ref[...] = (h + b4_ref[...]).astype(o_ref.dtype)


def prepare_params(params):
    """One-time parameter prep (call once, reuse every forward).

    Weights -> bf16 (native MXU input dtype, halves weight HBM traffic),
    biases stay f32. No padding: hidden dims are already multiples of 128 and
    n_state / n_action are consumed unpadded by the kernel.
    """
    prepped = {}
    for i in range(1, 5):
        prepped[f"w{i}"] = params[f"w{i}"].astype(jnp.bfloat16)
        prepped[f"b{i}"] = params[f"b{i}"].astype(jnp.float32)
    return prepped


def dqn_forward(x, prepped, *, block_b=1024):
    """x: (B, n_state) f32. prepped: output of prepare_params()."""
    B, K = x.shape
    H1 = prepped["w1"].shape[1]
    H2 = prepped["w2"].shape[1]
    H3 = prepped["w3"].shape[1]
    N = prepped["w4"].shape[1]
    assert prepped["w1"].shape[0] == K

    # Batch tiling: multiple of 8 rows (f32 sublane), capped at ceil(B/2) so
    # the "parallel" grid has >= 2 steps whenever possible (v7x has 2 TCs).
    B8 = _round_up(B, 8)
    TB = _round_up(min(block_b, B8), 8)
    if B8 > 8:
        TB = min(TB, _round_up(pl.cdiv(B8, 2), 8))
    Bp = _round_up(B8, TB)
    grid = (Bp // TB,)

    # Only the batch dim is padded (with zero rows); K/N are left as-is.
    xp = jnp.pad(x, ((0, Bp - B), (0, 0)))

    w1, w2, w3, w4 = (prepped[f"w{i}"] for i in range(1, 5))
    b1, b2, b3, b4 = (prepped[f"b{i}"] for i in range(1, 5))

    def resident(a):
        # Same block every grid step -> stays in VMEM, DMA'd once.
        return pl.BlockSpec(a.shape, lambda i, nd=a.ndim: (0,) * nd)

    # Advisory cost model for XLA scheduling around this call.
    flops = 2 * Bp * (K * H1 + H1 * H2 + H2 * H3 + H3 * N)
    weight_bytes = 2 * (w1.size + w2.size + w3.size + w4.size)
    bias_bytes = 4 * (b1.size + b2.size + b3.size + b4.size)
    bytes_accessed = int(xp.size * 4 + weight_bytes + bias_bytes + Bp * N * 4)
    cost = pl.CostEstimate(flops=int(flops), transcendentals=0,
                           bytes_accessed=bytes_accessed)

    # VMEM budget: double-buffered resident params + double-buffered x/out
    # tiles + per-tile intermediates (f32 dot results + bf16 ReLU copies),
    # 2x headroom, clamped to 48 MiB (below v7x's 64 MiB physical VMEM).
    act_bytes = TB * (H1 + H2 + H3) * (4 + 2) + TB * N * 4
    need = (2 * (weight_bytes + bias_bytes)
            + 2 * 4 * TB * (K + N) + act_bytes)
    vmem_limit = int(min(max(2 * need, 16 << 20), 48 << 20))

    out_p = pl.pallas_call(
        dqn_kernel,
        out_shape=jax.ShapeDtypeStruct((Bp, N), jnp.float32),
        grid=grid,
        in_specs=[
            pl.BlockSpec((TB, K), lambda i: (i, 0)),
            resident(w1), resident(b1),
            resident(w2), resident(b2),
            resident(w3), resident(b3),
            resident(w4), resident(b4),
        ],
        out_specs=pl.BlockSpec((TB, N), lambda i: (i, 0)),
        compiler_params=pltpu.CompilerParams(
            dimension_semantics=("parallel",),
            vmem_limit_bytes=vmem_limit),
        cost_estimate=cost,
    )(xp, w1, b1, w2, b2, w3, b3, w4, b4)

    return out_p[:B]


def init_params(key, n_state, n_action, muti_dim=1):
    """Deterministic init mimicking nn.Linear default U(-1/sqrt(in), 1/sqrt(in))."""
    dims = [n_state, 512 * muti_dim, 256 * muti_dim, 128 * muti_dim, n_action]
    params = {}
    for i in range(4):
        key, kw, kb = jax.random.split(key, 3)
        fan_in, fan_out = dims[i], dims[i + 1]
        bound = 1.0 / jnp.sqrt(jnp.float32(fan_in))
        params[f"w{i+1}"] = jax.random.uniform(
            kw, (fan_in, fan_out), jnp.float32, -bound, bound)
        params[f"b{i+1}"] = jax.random.uniform(
            kb, (1, fan_out), jnp.float32, -bound, bound)
    return params


def dqn_reference(x, params):
    """Pure-JAX reference mirroring the kernel's bf16-input / f32-accum numerics."""
    def lin(h, w, b):
        return jnp.dot(h.astype(jnp.bfloat16), w.astype(jnp.bfloat16),
                       preferred_element_type=jnp.float32) + b
    h = jnp.maximum(lin(x, params["w1"], params["b1"]), 0.0)
    h = jnp.maximum(lin(h, params["w2"], params["b2"]), 0.0)
    h = jnp.maximum(lin(h, params["w3"], params["b3"]), 0.0)
    return lin(h, params["w4"], params["b4"])


if __name__ == "__main__":
    key = jax.random.PRNGKey(0)
    n_state, n_action = 32, 8

    key, kp, kx1, kx2 = jax.random.split(key, 4)
    raw_params = init_params(kp, n_state, n_action, muti_dim=1)
    params = prepare_params(raw_params)   # one-time bf16 prep, reused below

    # Small smoke-test batch (original regime): B=2 -> one 8-row tile.
    x_small = jax.random.normal(kx1, (2, n_state), jnp.float32)
    out_small = jax.block_until_ready(dqn_forward(x_small, params))
    ref_small = dqn_reference(x_small, raw_params)
    assert out_small.shape == (2, n_action)
    assert jnp.allclose(out_small, ref_small, atol=2e-2, rtol=2e-2), \
        "mismatch vs reference (small batch)"

    # Ragged batch exercising a multi-step batch grid and row padding.
    x_big = jax.random.normal(kx2, (130, n_state), jnp.float32)
    out_big = jax.block_until_ready(dqn_forward(x_big, params, block_b=64))
    ref_big = dqn_reference(x_big, raw_params)
    assert out_big.shape == (130, n_action)
    assert jnp.allclose(out_big, ref_big, atol=2e-2, rtol=2e-2), \
        "mismatch vs reference (gridded batch)"

    print("KERNEL_OK")
</pallas_src>

<mosaic_0001>
module attributes {stable_mosaic.version = 11 : i64} {
  func.func @dqn_kernel(%arg0: i32, %arg1: memref<8x32xf32, #tpu.memory_space<vmem>>, %arg2: memref<32x512xbf16, #tpu.memory_space<vmem>>, %arg3: memref<1x512xf32, #tpu.memory_space<vmem>>, %arg4: memref<512x256xbf16, #tpu.memory_space<vmem>>, %arg5: memref<1x256xf32, #tpu.memory_space<vmem>>, %arg6: memref<256x128xbf16, #tpu.memory_space<vmem>>, %arg7: memref<1x128xf32, #tpu.memory_space<vmem>>, %arg8: memref<128x8xbf16, #tpu.memory_space<vmem>>, %arg9: memref<1x8xf32, #tpu.memory_space<vmem>>, %arg10: memref<8x8xf32, #tpu.memory_space<vmem>>) attributes {dimension_semantics = [#tpu.dimension_semantics<parallel>], iteration_bounds = array<i64: 1>, scalar_prefetch = 0 : i64, scratch_operands = 0 : i64, tpu.core_type = #tpu.core_type<tc>, window_params = [{transform_indices = @transform_0, window_bounds = array<i64: 8, 32>}, {pipeline_mode = #tpu.pipeline_mode<synchronous>, transform_indices = @transform_1, window_bounds = array<i64: 32, 512>}, {pipeline_mode = #tpu.pipeline_mode<synchronous>, transform_indices = @transform_2, window_bounds = array<i64: 1, 512>}, {pipeline_mode = #tpu.pipeline_mode<synchronous>, transform_indices = @transform_3, window_bounds = array<i64: 512, 256>}, {pipeline_mode = #tpu.pipeline_mode<synchronous>, transform_indices = @transform_4, window_bounds = array<i64: 1, 256>}, {pipeline_mode = #tpu.pipeline_mode<synchronous>, transform_indices = @transform_5, window_bounds = array<i64: 256, 128>}, {pipeline_mode = #tpu.pipeline_mode<synchronous>, transform_indices = @transform_6, window_bounds = array<i64: 1, 128>}, {pipeline_mode = #tpu.pipeline_mode<synchronous>, transform_indices = @transform_7, window_bounds = array<i64: 128, 8>}, {pipeline_mode = #tpu.pipeline_mode<synchronous>, transform_indices = @transform_8, window_bounds = array<i64: 1, 8>}, {transform_indices = @transform_9, window_bounds = array<i64: 8, 8>}]} {
    %c0 = arith.constant 0 : index
    %c0_0 = arith.constant 0 : index
    %0 = vector.load %arg1[%c0, %c0_0] : memref<8x32xf32, #tpu.memory_space<vmem>>, vector<8x32xf32>
    %1 = arith.truncf %0 : vector<8x32xf32> to vector<8x32xbf16>
    %c0_1 = arith.constant 0 : index
    %c0_2 = arith.constant 0 : index
    %2 = vector.load %arg2[%c0_1, %c0_2] : memref<32x512xbf16, #tpu.memory_space<vmem>>, vector<32x512xbf16>
    %cst = arith.constant dense<0.000000e+00> : vector<8x512xf32>
    %3 = tpu.matmul %1, %2, %cst {dimension_numbers = #tpu.dot_dimension_numbers<[1], [0], [0], [1], [0, 0, 1, 1], [], []>} : vector<8x32xbf16>, vector<32x512xbf16>, vector<8x512xf32> -> vector<8x512xf32>
    %c0_3 = arith.constant 0 : index
    %c0_4 = arith.constant 0 : index
    %4 = vector.load %arg3[%c0_3, %c0_4] : memref<1x512xf32, #tpu.memory_space<vmem>>, vector<1x512xf32>
    %5 = vector.broadcast %4 : vector<1x512xf32> to vector<8x512xf32>
    %6 = arith.addf %3, %5 : vector<8x512xf32>
    %cst_5 = arith.constant 0.000000e+00 : f32
    %7 = vector.broadcast %cst_5 : f32 to vector<8x512xf32>
    %8 = arith.maximumf %6, %7 : vector<8x512xf32>
    %9 = arith.truncf %8 : vector<8x512xf32> to vector<8x512xbf16>
    %c0_6 = arith.constant 0 : index
    %c0_7 = arith.constant 0 : index
    %10 = vector.load %arg4[%c0_6, %c0_7] : memref<512x256xbf16, #tpu.memory_space<vmem>>, vector<512x256xbf16>
    %cst_8 = arith.constant dense<0.000000e+00> : vector<8x256xf32>
    %11 = tpu.matmul %9, %10, %cst_8 {dimension_numbers = #tpu.dot_dimension_numbers<[1], [0], [0], [1], [0, 0, 1, 1], [], []>} : vector<8x512xbf16>, vector<512x256xbf16>, vector<8x256xf32> -> vector<8x256xf32>
    %c0_9 = arith.constant 0 : index
    %c0_10 = arith.constant 0 : index
    %12 = vector.load %arg5[%c0_9, %c0_10] : memref<1x256xf32, #tpu.memory_space<vmem>>, vector<1x256xf32>
    %13 = vector.broadcast %12 : vector<1x256xf32> to vector<8x256xf32>
    %14 = arith.addf %11, %13 : vector<8x256xf32>
    %cst_11 = arith.constant 0.000000e+00 : f32
    %15 = vector.broadcast %cst_11 : f32 to vector<8x256xf32>
    %16 = arith.maximumf %14, %15 : vector<8x256xf32>
    %17 = arith.truncf %16 : vector<8x256xf32> to vector<8x256xbf16>
    %c0_12 = arith.constant 0 : index
    %c0_13 = arith.constant 0 : index
    %18 = vector.load %arg6[%c0_12, %c0_13] : memref<256x128xbf16, #tpu.memory_space<vmem>>, vector<256x128xbf16>
    %cst_14 = arith.constant dense<0.000000e+00> : vector<8x128xf32>
    %19 = tpu.matmul %17, %18, %cst_14 {dimension_numbers = #tpu.dot_dimension_numbers<[1], [0], [0], [1], [0, 0, 1, 1], [], []>} : vector<8x256xbf16>, vector<256x128xbf16>, vector<8x128xf32> -> vector<8x128xf32>
    %c0_15 = arith.constant 0 : index
    %c0_16 = arith.constant 0 : index
    %20 = vector.load %arg7[%c0_15, %c0_16] : memref<1x128xf32, #tpu.memory_space<vmem>>, vector<1x128xf32>
    %21 = vector.broadcast %20 : vector<1x128xf32> to vector<8x128xf32>
    %22 = arith.addf %19, %21 : vector<8x128xf32>
    %cst_17 = arith.constant 0.000000e+00 : f32
    %23 = vector.broadcast %cst_17 : f32 to vector<8x128xf32>
    %24 = arith.maximumf %22, %23 : vector<8x128xf32>
    %25 = arith.truncf %24 : vector<8x128xf32> to vector<8x128xbf16>
    %c0_18 = arith.constant 0 : index
    %c0_19 = arith.constant 0 : index
    %26 = vector.load %arg8[%c0_18, %c0_19] : memref<128x8xbf16, #tpu.memory_space<vmem>>, vector<128x8xbf16>
    %cst_20 = arith.constant dense<0.000000e+00> : vector<8x8xf32>
    %27 = tpu.matmul %25, %26, %cst_20 {dimension_numbers = #tpu.dot_dimension_numbers<[1], [0], [0], [1], [0, 0, 1, 1], [], []>} : vector<8x128xbf16>, vector<128x8xbf16>, vector<8x8xf32> -> vector<8x8xf32>
    %c0_21 = arith.constant 0 : index
    %c0_22 = arith.constant 0 : index
    %28 = vector.load %arg9[%c0_21, %c0_22] : memref<1x8xf32, #tpu.memory_space<vmem>>, vector<1x8xf32>
    %29 = vector.broadcast %28 : vector<1x8xf32> to vector<8x8xf32>
    %30 = arith.addf %27, %29 : vector<8x8xf32>
    %c0_23 = arith.constant 0 : index
    %c0_24 = arith.constant 0 : index
    %31 = vector.load %arg10[%c0_23, %c0_24] : memref<8x8xf32, #tpu.memory_space<vmem>>, vector<8x8xf32>
    tpu.vector_store %arg10[%c0_23, %c0_24], %30 {strides = array<i32>} : memref<8x8xf32, #tpu.memory_space<vmem>>, vector<8x8xf32>,
    return
  }
  func.func @transform_0(%arg0: i32) -> (i32, i32) {
    %c0_i32 = arith.constant 0 : i32
    %c0_i32_0 = arith.constant 0 : i32
    return %arg0, %c0_i32 : i32, i32
  }
  func.func @transform_1(%arg0: i32) -> (i32, i32) {
    %c0_i32 = arith.constant 0 : i32
    %c0_i32_0 = arith.constant 0 : i32
    %c0_i32_1 = arith.constant 0 : i32
    return %c0_i32, %c0_i32_0 : i32, i32
  }
  func.func @transform_2(%arg0: i32) -> (i32, i32) {
    %c0_i32 = arith.constant 0 : i32
    %c0_i32_0 = arith.constant 0 : i32
    %c0_i32_1 = arith.constant 0 : i32
    return %c0_i32, %c0_i32_0 : i32, i32
  }
  func.func @transform_3(%arg0: i32) -> (i32, i32) {
    %c0_i32 = arith.constant 0 : i32
    %c0_i32_0 = arith.constant 0 : i32
    %c0_i32_1 = arith.constant 0 : i32
    return %c0_i32, %c0_i32_0 : i32, i32
  }
  func.func @transform_4(%arg0: i32) -> (i32, i32) {
    %c0_i32 = arith.constant 0 : i32
    %c0_i32_0 = arith.constant 0 : i32
    %c0_i32_1 = arith.constant 0 : i32
    return %c0_i32, %c0_i32_0 : i32, i32
  }
  func.func @transform_5(%arg0: i32) -> (i32, i32) {
    %c0_i32 = arith.constant 0 : i32
    %c0_i32_0 = arith.constant 0 : i32
    %c0_i32_1 = arith.constant 0 : i32
    return %c0_i32, %c0_i32_0 : i32, i32
  }
  func.func @transform_6(%arg0: i32) -> (i32, i32) {
    %c0_i32 = arith.constant 0 : i32
    %c0_i32_0 = arith.constant 0 : i32
    %c0_i32_1 = arith.constant 0 : i32
    return %c0_i32, %c0_i32_0 : i32, i32
  }
  func.func @transform_7(%arg0: i32) -> (i32, i32) {
    %c0_i32 = arith.constant 0 : i32
    %c0_i32_0 = arith.constant 0 : i32
    %c0_i32_1 = arith.constant 0 : i32
    return %c0_i32, %c0_i32_0 : i32, i32
  }
  func.func @transform_8(%arg0: i32) -> (i32, i32) {
    %c0_i32 = arith.constant 0 : i32
    %c0_i32_0 = arith.constant 0 : i32
    %c0_i32_1 = arith.constant 0 : i32
    return %c0_i32, %c0_i32_0 : i32, i32
  }
  func.func @transform_9(%arg0: i32) -> (i32, i32) {
    %c0_i32 = arith.constant 0 : i32
    %c0_i32_0 = arith.constant 0 : i32
    return %arg0, %c0_i32 : i32, i32
  }
}

</mosaic_0001>

<bundles_post_ra>
// kernel: tpu_custom_call.1
= control target key start
LH: loop header
LB: loop body
LE: loop exit
PB: predicated region body
PF: predicated region fallthrough
CT: control target
= control target key end

     0   :  { %14 = vsyncpa [#allocation3], 0  ;;  %s1554_s0 = inlined_call_operand.hbm [shape: f32[8,32], index: 0, kind: input, shape index: {}]   ;;  %s1555_s1 = inlined_call_operand.vmem [shape: bf16[32,512], index: 1, kind: input, shape index: {}]   ;;  %s1556_s2 = inlined_call_operand.vmem [shape: f32[1,512], index: 2, kind: input, shape index: {}]   ;;  %s1557_s3 = inlined_call_operand.hbm [shape: bf16[512,256], index: 3, kind: input, shape index: {}]   ;;  %s1558_s4 = inlined_call_operand.vmem [shape: f32[1,256], index: 4, kind: input, shape index: {}]   ;;  %s1559_s5 = inlined_call_operand.hbm [shape: bf16[256,128], index: 5, kind: input, shape index: {}]   ;;  %s1560_s6 = inlined_call_operand.vmem [shape: f32[1,128], index: 6, kind: input, shape index: {}]   ;;  %s1561_s7 = inlined_call_operand.vmem [shape: bf16[128,8], index: 7, kind: input, shape index: {}]   ;;  %s1562_s8 = inlined_call_operand.vmem [shape: f32[1,8], index: 8, kind: input, shape index: {}]   ;;  %s1563_s9 = inlined_call_operand.hbm [shape: f32[8,8], index: 9, kind: output, shape index: {}]  }
   0x1   :  { %15 = vsyncpa [#allocation6], 0 }
   0x2   :  { %16 = vsyncpa [#allocation4], 0  ;;  %s1407_s30 = smov [#allocation5]  }
   0x3   :  { %s36_s10 = sshll.u32 %s1407_s30, 4  ;;  %s37_s10 = int_to_ptr.vmem [resolvable:$true] %s36_s10 }
   0x4   :  { %s1329_s11 = scalar_lea.vmem %s37_s10, 8192  ;;  %p1334_p1 = scmp.lt.s32.totalorder %s37_s10, %s37_s10 }
   0x5   :  { %p1330_p0 = scmp.ne.s32.totalorder %s37_s10, %s1329_s11  ;;  %p1335_p2 = scmp.lt.s32.totalorder %s1329_s11, %s1329_s11 }
   0x7   :  { %p1336_p3 = por %p1335_p2, %p1334_p1 }
   0x9   :  { %p1337_p4 = pnand %p1336_p3, %p1330_p0 }
   0xb   :  { %1340 = shalt.err (!%p1337_p4)
}
   0xc   :  { %s1408_s12 = smov 128   ;;  %s1409_s13 = smov 8  }
   0xd   :  { %42 = dma.hbm_to_vmem [thread:$0]  %s1557_s3, 8192, %s37_s10, [#allocation6], %s1408_s12, %s1408_s12, %s1409_s13  }
   0xe   :  { %s1410_s16 = smov [#allocation2]   ;;  %s1411_s18 = smov [#allocation7]  }
   0xf   :  { %s23_s17 = sshll.u32 %s1410_s16, 4  ;;  %s50_s19 = sshll.u32 %s1411_s18, 4  ;;  %s24_s17 = int_to_ptr.vmem [resolvable:$true] %s23_s17  ;;  %s51_s19 = int_to_ptr.vmem [resolvable:$true] %s50_s19 }
  0x10   :  { %s1349_s20 = scalar_lea.vmem %s24_s17, 128  ;;  %p1354_p6 = scmp.lt.s32.totalorder %s24_s17, %s24_s17 }
  0x11   :  { %p1350_p5 = scmp.ne.s32.totalorder %s24_s17, %s1349_s20  ;;  %p1355_p7 = scmp.lt.s32.totalorder %s1349_s20, %s1349_s20 }
  0x13   :  { %p1356_p8 = por %p1355_p7, %p1354_p6 }
  0x15   :  { %p1357_p9 = pnand %p1356_p8, %p1350_p5 }
  0x17   :  { %1360 = shalt.err (!%p1357_p9)
}
  0x18   :  { %26 = dma.hbm_to_vmem [thread:$0]  %s1554_s0, 128, %s24_s17, [#allocation3]  }
  0x19   :  { %s1369_s23 = scalar_lea.vmem %s51_s19, 2048  ;;  %p1374_p11 = scmp.lt.s32.totalorder %s51_s19, %s51_s19 }
  0x1a   :  { %p1370_p10 = scmp.ne.s32.totalorder %s51_s19, %s1369_s23  ;;  %p1375_p12 = scmp.lt.s32.totalorder %s1369_s23, %s1369_s23 }
  0x1c   :  { %p1376_p13 = por %p1375_p12, %p1374_p11 }
  0x1e   :  { %p1377_p0 = pnand %p1376_p13, %p1370_p10 }
  0x20   :  { %1380 = shalt.err (!%p1377_p0)
}
  0x21   :  { %s1412_s3 = smov 64   ;;  %s1413_s24 = smov 4  }
  0x22   :  { %56 = dma.hbm_to_vmem [thread:$0]  %s1559_s5, 2048, %s51_s19, [#allocation6], %s1412_s3, %s1412_s3, %s1413_s24  }
  0x23   :  { %1401 = dma.done.wait [#allocation3], 128  }
  0x24   :  { %1402 = vsyncadd [#allocation3], 4294967168 }
  0x25   :  { %1403 = dma.done.wait [#allocation6], 10240  }
  0x26   :  { %1404 = vsyncadd [#allocation6], 4294957056  ;;  %v1414_v0 = vmov 0   ;;  %v1189_v1 = vld [vmem:[%s1555_s1 + $0x24] ss:$16 sps:$4 sm:$0xff]   ;;  %vm145_vm0 = vcmask 261120  }
  0x27   :  { %181 = vmatprep.mubr.bf16.mxu0 %v1414_v0  ;;  %222 = vmatprep.mubr.bf16.mxu1 %v1414_v0  ;;  %v1191_v2 = vld [vmem:[%s1555_s1 + $0x2c] ss:$16 sps:$4 sm:$0xff]   ;;  %v1193_v3 = vld [vmem:[%s1555_s1 + $0x20] ss:$16 sps:$4 sm:$0xff]   ;;  %v1194_v4 = vld [vmem:[%s1555_s1 + $0x28] ss:$16 sps:$4 sm:$0xff]  }
  0x28   :  { %161 = vmatprep.subr.bf16.mxu0 %v1189_v1  ;;  %202 = vmatprep.subr.bf16.mxu1 %v1191_v2  ;;  %v1195_v5 = vld [vmem:[%s1555_s1 + $0x4] ss:$16 sps:$4 sm:$0xff]   ;;  %v1197_v6 = vld [vmem:[%s1555_s1 + $0xc] ss:$16 sps:$4 sm:$0xff]   ;;  %v1199_v7 = vld [vmem:[%s1555_s1] ss:$16 sps:$4 sm:$0xff]  }
  0x29   :  { %162 = vmatpush1.bf16.msra.mxu0 %v1193_v3  ;;  %203 = vmatpush1.bf16.msra.mxu1 %v1194_v4  ;;  %v1200_v8 = vld [vmem:[%s1555_s1 + $0x8] ss:$16 sps:$4 sm:$0xff]   ;;  %v73_v9 = vld [vmem:[#allocation2] sm:$0xff]  ;;  %v1209_v15 = vld [vmem:[#allocation5 + $0x64] ss:$8 sps:$4 sm:$0xff]   ;;  %vm1416_vm1 = vmmov 0  }
  0x2a   :  { %163 = vmatprep.subr.bf16.mxu0 %v1195_v5  ;;  %204 = vmatprep.subr.bf16.mxu1 %v1197_v6  ;;  %v1201_v10 = vld [vmem:[#allocation5 + $0x70] ss:$8 sps:$4 sm:$0xff]   ;;  %v1203_v11 = vld [vmem:[#allocation5 + $0x74] ss:$8 sps:$4 sm:$0xff]   ;;  %v74_v12 = vpack.c.bf16 %v73_v9, %v73_v9  ;;  %v1212_v16 = vld [vmem:[#allocation5 + $0x164] ss:$8 sps:$4 sm:$0xff]  }
  0x2b   :  { %v1204_v13 = vld [vmem:[#allocation5 + $0x170] ss:$8 sps:$4 sm:$0xff]   ;;  %v1206_v14 = vld [vmem:[#allocation5 + $0x174] ss:$8 sps:$4 sm:$0xff]   ;;  %v1207_v17 = vld [vmem:[#allocation5 + $0x60] ss:$8 sps:$4 sm:$0xff]  }
  0x2c   :  { %v1210_v18 = vld [vmem:[#allocation5 + $0x160] ss:$8 sps:$4 sm:$0xff]   ;;  %v1215_v19 = vld [vmem:[#allocation5 + $0x54] ss:$8 sps:$4 sm:$0xff]   ;;  %v1213_v21 = vld [vmem:[#allocation5 + $0x50] ss:$8 sps:$4 sm:$0xff]  }
  0x2d   :  { %164 = vmatpush1.bf16.msra.mxu0 %v1199_v7  ;;  %205 = vmatpush1.bf16.msra.mxu1 %v1200_v8  ;;  %v1218_v20 = vld [vmem:[#allocation5 + $0x154] ss:$8 sps:$4 sm:$0xff]   ;;  %v1216_v22 = vld [vmem:[#allocation5 + $0x150] ss:$8 sps:$4 sm:$0xff]   ;;  %v1221_v23 = vld [vmem:[#allocation5 + $0x44] ss:$8 sps:$4 sm:$0xff]  }
  0x2e   :  { %635 = vmatprep.subr.bf16.mxu0 %v1203_v11  ;;  %676 = vmatprep.subr.bf16.mxu1 %v1206_v14  ;;  %v1224_v24 = vld [vmem:[#allocation5 + $0x144] ss:$8 sps:$4 sm:$0xff]   ;;  %v1219_v25 = vld [vmem:[#allocation5 + $0x40] ss:$8 sps:$4 sm:$0xff]   ;;  %v1227_v27 = vld [vmem:[#allocation5 + $0x34] ss:$8 sps:$4 sm:$0xff]  }
  0x2f   :  { %v1222_v26 = vld [vmem:[#allocation5 + $0x140] ss:$8 sps:$4 sm:$0xff]   ;;  %v1230_v28 = vld [vmem:[#allocation5 + $0x134] ss:$8 sps:$4 sm:$0xff]   ;;  %v1225_v29 = vld [vmem:[#allocation5 + $0x30] ss:$8 sps:$4 sm:$0xff]  }
  0x30   :  { %1035 = vmatmul.mubr.msk.bf16.vlgmr.msra.gmra.mxu0 %vm145_vm0, %v74_v12  ;;  %1036 = vmatmul.mubr.msk.bf16.vlgmr.msra.gmra.mxu1 %vm145_vm0, %v74_v12  ;;  %v1228_v30 = vld [vmem:[#allocation5 + $0x130] ss:$8 sps:$4 sm:$0xff]   ;;  %v1233_v31 = vld [vmem:[#allocation5 + $0x24] ss:$8 sps:$4 sm:$0xff]   ;;  %v1231_v33 = vld [vmem:[#allocation5 + $0x20] ss:$8 sps:$4 sm:$0xff]   ;;  %v85_v12 = vlaneseq }
  0x31   :  { %636 = vmatpush1.bf16.msra.mxu0 %v1201_v10  ;;  %677 = vmatpush1.bf16.msra.mxu1 %v1204_v13  ;;  %v1236_v32 = vld [vmem:[#allocation5 + $0x124] ss:$8 sps:$4 sm:$0xff]   ;;  %v1234_v34 = vld [vmem:[#allocation5 + $0x120] ss:$8 sps:$4 sm:$0xff]   ;;  %v1239_v35 = vld [vmem:[#allocation5 + $0x14] ss:$8 sps:$4 sm:$0xff]  }
  0x32   :  { %637 = vmatprep.subr.bf16.mxu0 %v1209_v15  ;;  %678 = vmatprep.subr.bf16.mxu1 %v1212_v16  ;;  %v1242_v36 = vld [vmem:[#allocation5 + $0x114] ss:$8 sps:$4 sm:$0xff]   ;;  %v1237_v37 = vld [vmem:[#allocation5 + $0x10] ss:$8 sps:$4 sm:$0xff]   ;;  %v1245_v39 = vld [vmem:[#allocation5 + $0x4] ss:$8 sps:$4 sm:$0xff]  }
  0x33   :  { %v1240_v38 = vld [vmem:[#allocation5 + $0x110] ss:$8 sps:$4 sm:$0xff]   ;;  %v1248_v40 = vld [vmem:[#allocation5 + $0x104] ss:$8 sps:$4 sm:$0xff]   ;;  %v1243_v41 = vld [vmem:[#allocation5] ss:$8 sps:$4 sm:$0xff]  }
  0x34   :  { %v1246_v42 = vld [vmem:[#allocation5 + $0x100] ss:$8 sps:$4 sm:$0xff]   ;;  %v1251_v43 = vld [vmem:[#allocation5 + $0xf4] ss:$8 sps:$4 sm:$0xff]   ;;  %v1249_v45 = vld [vmem:[#allocation5 + $0xf0] ss:$8 sps:$4 sm:$0xff]  }
  0x35   :  { %638 = vmatpush1.bf16.msra.mxu0 %v1207_v17  ;;  %679 = vmatpush1.bf16.msra.mxu1 %v1210_v18  ;;  %v1254_v44 = vld [vmem:[#allocation5 + $0x1f4] ss:$8 sps:$4 sm:$0xff]   ;;  %v1252_v46 = vld [vmem:[#allocation5 + $0x1f0] ss:$8 sps:$4 sm:$0xff]   ;;  %v1257_v47 = vld [vmem:[#allocation5 + $0xe4] ss:$8 sps:$4 sm:$0xff]  }
  0x36   :  { %639 = vmatprep.subr.bf16.mxu0 %v1215_v19  ;;  %680 = vmatprep.subr.bf16.mxu1 %v1218_v20  ;;  %v1260_v48 = vld [vmem:[#allocation5 + $0x1e4] ss:$8 sps:$4 sm:$0xff]   ;;  %v1255_v49 = vld [vmem:[#allocation5 + $0xe0] ss:$8 sps:$4 sm:$0xff]   ;;  %v1263_v51 = vld [vmem:[#allocation5 + $0xd4] ss:$8 sps:$4 sm:$0xff]  }
  0x37   :  { %v1258_v50 = vld [vmem:[#allocation5 + $0x1e0] ss:$8 sps:$4 sm:$0xff]   ;;  %v1266_v52 = vld [vmem:[#allocation5 + $0x1d4] ss:$8 sps:$4 sm:$0xff]   ;;  %v1261_v53 = vld [vmem:[#allocation5 + $0xd0] ss:$8 sps:$4 sm:$0xff]  }
  0x38   :  { %v1264_v54 = vld [vmem:[#allocation5 + $0x1d0] ss:$8 sps:$4 sm:$0xff]   ;;  %v1269_v55 = vld [vmem:[#allocation5 + $0xc4] ss:$8 sps:$4 sm:$0xff]   ;;  %v1267_v57 = vld [vmem:[#allocation5 + $0xc0] ss:$8 sps:$4 sm:$0xff]  }
  0x39   :  { %640 = vmatpush1.bf16.msra.mxu0 %v1213_v21  ;;  %681 = vmatpush1.bf16.msra.mxu1 %v1216_v22  ;;  %v1272_v56 = vld [vmem:[#allocation5 + $0x1c4] ss:$8 sps:$4 sm:$0xff]   ;;  %v1270_v58 = vld [vmem:[#allocation5 + $0x1c0] ss:$8 sps:$4 sm:$0xff]   ;;  %v1275_v59 = vld [vmem:[#allocation5 + $0xb4] ss:$8 sps:$4 sm:$0xff]  }
  0x3a   :  { %641 = vmatprep.subr.bf16.mxu0 %v1221_v23  ;;  %682 = vmatprep.subr.bf16.mxu1 %v1224_v24  ;;  %v1278_v60 = vld [vmem:[#allocation5 + $0x1b4] ss:$8 sps:$4 sm:$0xff]   ;;  %v1273_v61 = vld [vmem:[#allocation5 + $0xb0] ss:$8 sps:$4 sm:$0xff]   ;;  %v1281_v63 = vld [vmem:[#allocation5 + $0xa4] ss:$8 sps:$4 sm:$0xff]  }
  0x3b   :  { %v1276_v62 = vld [vmem:[#allocation5 + $0x1b0] ss:$8 sps:$4 sm:$0xff]   ;;  %v1284_v0 = vld [vmem:[#allocation5 + $0x1a4] ss:$8 sps:$4 sm:$0xff]   ;;  %v1279_v1 = vld [vmem:[#allocation5 + $0xa0] ss:$8 sps:$4 sm:$0xff]  }
  0x3c   :  { %v1282_v2 = vld [vmem:[#allocation5 + $0x1a0] ss:$8 sps:$4 sm:$0xff]   ;;  %v1287_v3 = vld [vmem:[#allocation5 + $0x94] ss:$8 sps:$4 sm:$0xff]   ;;  %v1285_v5 = vld [vmem:[#allocation5 + $0x90] ss:$8 sps:$4 sm:$0xff]  }
  0x3d   :  { %642 = vmatpush1.bf16.msra.mxu0 %v1219_v25  ;;  %683 = vmatpush1.bf16.msra.mxu1 %v1222_v26  ;;  %v1290_v4 = vld [vmem:[#allocation5 + $0x194] ss:$8 sps:$4 sm:$0xff]   ;;  %v1288_v6 = vld [vmem:[#allocation5 + $0x190] ss:$8 sps:$4 sm:$0xff]   ;;  %v1293_v7 = vld [vmem:[#allocation5 + $0x84] ss:$8 sps:$4 sm:$0xff]  }
  0x3e   :  { %643 = vmatprep.subr.bf16.mxu0 %v1227_v27  ;;  %684 = vmatprep.subr.bf16.mxu1 %v1230_v28  ;;  %v1296_v8 = vld [vmem:[#allocation5 + $0x184] ss:$8 sps:$4 sm:$0xff]   ;;  %v1291_v9 = vld [vmem:[#allocation5 + $0x80] ss:$8 sps:$4 sm:$0xff]   ;;  %v1297_v11 = vld [vmem:[#allocation7 + $0x78] sm:$0xff]   ;;  %v1501_v13 = vshrl.u32 %v85_v12, 7 }
  0x3f   :  { %v1294_v10 = vld [vmem:[#allocation5 + $0x180] ss:$8 sps:$4 sm:$0xff]   ;;  %v83_v16 = vld [vmem:[%s1556_s2] sm:$0xf]  ;;  %vm1009_vm2 = vcmask 64512  }
  0x40   :  { %v87_v14 = vsub.s32 0, %v1501_v13  ;;  %v95_v15 = vsub.s32 2, %v1501_v13  ;;  %v91_v17 = vsub.s32 1, %v1501_v13  ;;  %v99_v18 = vsub.s32 3, %v1501_v13  ;;  %v1318_v13 = vld [vmem:[%s1561_s7 + $0x10] sm:$0xff]  }
  0x41   :  { %644 = vmatpush1.bf16.msra.mxu0 %v1225_v29  ;;  %685 = vmatpush1.bf16.msra.mxu1 %v1228_v30 }
  0x42   :  { %645 = vmatprep.subr.bf16.mxu0 %v1233_v31  ;;  %686 = vmatprep.subr.bf16.mxu1 %v1236_v32  ;;  %v88_v19 = vrot.slane %v83_v16, %v87_v14  ;;  %v96_v20 = vrot.slane %v83_v16, %v95_v15  ;;  %v92_v21 = vrot.slane %v83_v16, %v91_v17 }
  0x43   :  { %v100_v22 = vrot.slane %v83_v16, %v99_v18 }
  0x45   :  { %646 = vmatpush1.bf16.msra.mxu0 %v1231_v33  ;;  %687 = vmatpush1.bf16.msra.mxu1 %v1234_v34 }
  0x46   :  { %647 = vmatprep.subr.bf16.mxu0 %v1239_v35  ;;  %688 = vmatprep.subr.bf16.mxu1 %v1242_v36 }
  0x49   :  { %648 = vmatpush1.bf16.msra.mxu0 %v1237_v37  ;;  %689 = vmatpush1.bf16.msra.mxu1 %v1240_v38 }
  0x4a   :  { %649 = vmatprep.subr.bf16.mxu0 %v1245_v39  ;;  %690 = vmatprep.subr.bf16.mxu1 %v1248_v40 }
  0x4d   :  { %650 = vmatpush1.bf16.msra.mxu0 %v1243_v41  ;;  %691 = vmatpush1.bf16.msra.mxu1 %v1246_v42  ;;  %v1298_v42 = vld [vmem:[#allocation7 + $0x38] sm:$0xff]  }
  0x4e   :  { %651 = vmatprep.subr.bf16.mxu0 %v1251_v43  ;;  %692 = vmatprep.subr.bf16.mxu1 %v1254_v44  ;;  %v1299_v44 = vld [vmem:[#allocation7 + $0x70] sm:$0xff]  }
  0x51   :  { %652 = vmatpush2.bf16.msra.mxu0 %v1249_v45  ;;  %693 = vmatpush2.bf16.msra.mxu1 %v1252_v46  ;;  %v1300_v45 = vld [vmem:[#allocation7 + $0x30] sm:$0xff]   ;;  %v1301_v46 = vld [vmem:[#allocation7 + $0x68] sm:$0xff]  }
  0x52   :  { %653 = vmatprep.subr.bf16.mxu0 %v1257_v47  ;;  %694 = vmatprep.subr.bf16.mxu1 %v1260_v48  ;;  %v1302_v47 = vld [vmem:[#allocation7 + $0x28] sm:$0xff]   ;;  %v1303_v48 = vld [vmem:[#allocation7 + $0x60] sm:$0xff]  }
  0x55   :  { %654 = vmatpush2.bf16.msra.mxu0 %v1255_v49  ;;  %695 = vmatpush2.bf16.msra.mxu1 %v1258_v50  ;;  %v1304_v49 = vld [vmem:[#allocation7 + $0x20] sm:$0xff]   ;;  %v1305_v50 = vld [vmem:[#allocation7 + $0x58] sm:$0xff]  }
  0x56   :  { %655 = vmatprep.subr.bf16.mxu0 %v1263_v51  ;;  %696 = vmatprep.subr.bf16.mxu1 %v1266_v52  ;;  %v1306_v51 = vld [vmem:[#allocation7 + $0x18] sm:$0xff]   ;;  %v1307_v52 = vld [vmem:[#allocation7 + $0x50] sm:$0xff]  }
  0x59   :  { %656 = vmatpush2.bf16.msra.mxu0 %v1261_v53  ;;  %697 = vmatpush2.bf16.msra.mxu1 %v1264_v54  ;;  %v1308_v53 = vld [vmem:[#allocation7 + $0x10] sm:$0xff]   ;;  %v1309_v54 = vld [vmem:[#allocation7 + $0x48] sm:$0xff]  }
  0x5a   :  { %657 = vmatprep.subr.bf16.mxu0 %v1269_v55  ;;  %698 = vmatprep.subr.bf16.mxu1 %v1272_v56  ;;  %v1310_v55 = vld [vmem:[#allocation7 + $0x8] sm:$0xff]   ;;  %v1311_v56 = vld [vmem:[#allocation7 + $0x40] sm:$0xff]  }
  0x5d   :  { %658 = vmatpush2.bf16.msra.mxu0 %v1267_v57  ;;  %699 = vmatpush2.bf16.msra.mxu1 %v1270_v58  ;;  %v1312_v57 = vld [vmem:[#allocation7] sm:$0xff]   ;;  %v1313_v58 = vld [vmem:[%s1561_s7 + $0x38] sm:$0xff]  }
  0x5e   :  { %659 = vmatprep.subr.bf16.mxu0 %v1275_v59  ;;  %700 = vmatprep.subr.bf16.mxu1 %v1278_v60  ;;  %v1415_v59 = vmov 0.0   ;;  %v1314_v60 = vld [vmem:[%s1561_s7 + $0x30] sm:$0xff]  }
  0x61   :  { %660 = vmatpush2.bf16.msra.mxu0 %v1273_v61  ;;  %701 = vmatpush2.bf16.msra.mxu1 %v1276_v62  ;;  %v1315_v61 = vld [vmem:[%s1561_s7 + $0x28] sm:$0xff]   ;;  %v1316_v62 = vld [vmem:[%s1561_s7 + $0x20] sm:$0xff]  }
  0x62   :  { %661 = vmatprep.subr.bf16.mxu0 %v1281_v63  ;;  %702 = vmatprep.subr.bf16.mxu1 %v1284_v0  ;;  %v1317_v63 = vld [vmem:[%s1561_s7 + $0x18] sm:$0xff]   ;;  %v303_v0 = vld [vmem:[%s1558_s4] sm:$0x3] }
  0x65   :  { %662 = vmatpush2.bf16.msra.mxu0 %v1279_v1  ;;  %703 = vmatpush2.bf16.msra.mxu1 %v1282_v2  ;;  %v308_v1 = vrot.slane %v303_v0, %v87_v14  ;;  %v312_v2 = vrot.slane %v303_v0, %v91_v17  ;;  %v1319_v14 = vld [vmem:[%s1561_s7 + $0x8] sm:$0xff]   ;;  %v1320_v17 = vld [vmem:[%s1561_s7] sm:$0xff]   ;;  %s1417_s7 = smov [#allocation8]  }
  0x66   :  { %663 = vmatprep.subr.bf16.mxu0 %v1287_v3  ;;  %704 = vmatprep.subr.bf16.mxu1 %v1290_v4  ;;  %s1017_s17 = sshll.u32 %s1417_s7, 4  ;;  %s1018_s17 = int_to_ptr.vmem [resolvable:$true] %s1017_s17 }
  0x67   :  { %p1386_p2 = scmp.lt.s32.totalorder %s1018_s17, %s1018_s17 }
  0x69   :  { %664 = vmatpush2.bf16.msra.mxu0 %v1285_v5  ;;  %705 = vmatpush2.bf16.msra.mxu1 %v1288_v6 }
  0x6a   :  { %665 = vmatprep.subr.bf16.mxu0 %v1293_v7  ;;  %706 = vmatprep.subr.bf16.mxu1 %v1296_v8 }
  0x6d   :  { %666 = vmatpush2.bf16.msra.mxu0 %v1291_v9  ;;  %707 = vmatpush2.bf16.msra.mxu1 %v1294_v10 }
  0x6e   :  { %1127 = vmatprep.subr.bf16.mxu0 %v1297_v11  ;;  %1158 = vmatprep.subr.bf16.mxu1 %v1415_v59 }
  0xf0   :  { %v183_v23 = vpop.f32.mrf.mxu0  ;;  %v224_v24 = vpop.f32.mrf.mxu1 }
  0xf1   :  { %v184_v25 = vadd.f32 %v183_v23, %v88_v19  ;;  %v225_v26 = vadd.f32 %v224_v24, %v96_v20  ;;  %v1101_v23 = vld [vmem:[%s1560_s6] ss:$0 sm:$0xff]  ;;  %s1381_s6 = scalar_lea.vmem %s1018_s17, 128 }
  0xf2   :  { %v185_v27 = vpop.f32.mrf.mxu0  ;;  %v226_v28 = vpop.f32.mrf.mxu1  ;;  %p1382_p1 = scmp.ne.s32.totalorder %s1018_s17, %s1381_s6  ;;  %p1387_p3 = scmp.lt.s32.totalorder %s1381_s6, %s1381_s6 }
  0xf3   :  { %v233_v29 = vmax.f32 %v225_v26, 0.0  ;;  %v186_v30 = vadd.f32 %v185_v27, %v92_v21  ;;  %v227_v31 = vadd.f32 %v226_v28, %v100_v22  ;;  %v231_v32 = vmax.f32 %v184_v25, 0.0 }
  0xf4   :  { %v187_v33 = vpop.f32.mrf.mxu0  ;;  %v228_v34 = vpop.f32.mrf.mxu1  ;;  %p1388_p4 = por %p1387_p3, %p1386_p2 }
  0xf5   :  { %v232_v35 = vmax.f32 %v186_v30, 0.0  ;;  %v234_v36 = vmax.f32 %v227_v31, 0.0  ;;  %v237_v37 = vpack.c.bf16 %v233_v29, %v233_v29  ;;  %v235_v43 = vpack.c.bf16 %v231_v32, %v231_v32  ;;  %v1118_v31 = vld [vmem:[%s1562_s8] ss:$0 sm:$0xff] }
  0xf6   :  { %v188_v38 = vpop.f32.mrf.mxu0  ;;  %v229_v39 = vpop.f32.mrf.mxu1  ;;  %p1389_p5 = pnand %p1388_p4, %p1382_p1 }
  0xf7   :  { %v236_v40 = vpack.c.bf16 %v232_v35, %v232_v35  ;;  %v238_v41 = vpack.c.bf16 %v234_v36, %v234_v36 }
  0xf9   :  { %667 = vmatprep.mubr.bf16.mxu0 %v236_v40  ;;  %708 = vmatprep.mubr.bf16.mxu1 %v238_v41 }
  0xfa   :  { %668 = vmatmul.mubr.bf16.vlgmr.msra.gmra.mxu0 %v235_v43  ;;  %709 = vmatmul.mubr.bf16.vlgmr.msra.gmra.mxu1 %v237_v37 }
  0xfb   :  { %1128 = vmatpush3.bf16.msra.mxu0 %v1298_v42  ;;  %1159 = vmatpush3.bf16.msra.mxu1 %v1313_v58 }
  0xfc   :  { %1129 = vmatprep.subr.bf16.mxu0 %v1299_v44  ;;  %1160 = vmatprep.subr.bf16.mxu1 %v1415_v59 }
  0xfd   :  { %1174 = vmatprep.mubr.msk.bf16.mxu1 %vm1416_vm1, %v1415_v59 }
  0xff   :  { %1130 = vmatpush3.bf16.msra.mxu0 %v1300_v45  ;;  %1161 = vmatpush3.bf16.msra.mxu1 %v1314_v60 }
 0x100   :  { %1131 = vmatprep.subr.bf16.mxu0 %v1301_v46  ;;  %1162 = vmatprep.subr.bf16.mxu1 %v1415_v59 }
 0x103   :  { %1132 = vmatpush3.bf16.msra.mxu0 %v1302_v47  ;;  %1163 = vmatpush3.bf16.msra.mxu1 %v1315_v61 }
 0x104   :  { %1133 = vmatprep.subr.bf16.mxu0 %v1303_v48  ;;  %1164 = vmatprep.subr.bf16.mxu1 %v1415_v59 }
 0x107   :  { %1134 = vmatpush3.bf16.msra.mxu0 %v1304_v49  ;;  %1165 = vmatpush3.bf16.msra.mxu1 %v1316_v62 }
 0x108   :  { %1135 = vmatprep.subr.bf16.mxu0 %v1305_v50  ;;  %1166 = vmatprep.subr.bf16.mxu1 %v1415_v59 }
 0x10b   :  { %1136 = vmatpush3.bf16.msra.mxu0 %v1306_v51  ;;  %1167 = vmatpush3.bf16.msra.mxu1 %v1317_v63 }
 0x10c   :  { %1137 = vmatprep.subr.bf16.mxu0 %v1307_v52  ;;  %1168 = vmatprep.subr.bf16.mxu1 %v1415_v59 }
 0x10f   :  { %1138 = vmatpush3.bf16.msra.mxu0 %v1308_v53  ;;  %1169 = vmatpush3.bf16.msra.mxu1 %v1318_v13 }
 0x110   :  { %1139 = vmatprep.subr.bf16.mxu0 %v1309_v54  ;;  %1170 = vmatprep.subr.bf16.mxu1 %v1415_v59 }
 0x113   :  { %1140 = vmatpush3.bf16.msra.mxu0 %v1310_v55  ;;  %1171 = vmatpush3.bf16.msra.mxu1 %v1319_v14 }
 0x114   :  { %1141 = vmatprep.subr.bf16.mxu0 %v1311_v56  ;;  %1172 = vmatprep.subr.bf16.mxu1 %v1415_v59 }
 0x117   :  { %1142 = vmatpush3.bf16.msra.mxu0 %v1312_v57  ;;  %1173 = vmatpush3.bf16.msra.mxu1 %v1320_v17 }
 0x1ba   :  { %v669_v3 = vpop.f32.mrf.mxu0  ;;  %v710_v4 = vpop.f32.mrf.mxu1 }
 0x1bb   :  { %v670_v5 = vadd.f32 %v669_v3, %v308_v1 }
 0x1bc   :  { %v671_v6 = vpop.f32.mrf.mxu0  ;;  %v712_v7 = vpop.f32.mrf.mxu1 }
 0x1bd   :  { %v711_v8 = vadd.f32 %v710_v4, %v670_v5  ;;  %v672_v9 = vadd.f32 %v671_v6, %v312_v2 }
 0x1be   :  { %v673_v10 = vpop.f32.mrf.mxu0  ;;  %v714_v11 = vpop.f32.mrf.mxu1 }
 0x1bf   :  { %v713_v12 = vadd.f32 %v712_v7, %v672_v9  ;;  %v717_v15 = vmax.f32 %v711_v8, 0.0 }
 0x1c0   :  { %v674_v16 = vpop.f32.mrf.mxu0  ;;  %v715_v18 = vpop.f32.mrf.mxu1 }
 0x1c1   :  { %v718_v19 = vmax.f32 %v713_v12, 0.0  ;;  %v719_v21 = vpack.c.bf16 %v717_v15, %v717_v15 }
 0x1c3   :  { %v720_v20 = vpack.c.bf16 %v718_v19, %v718_v19 }
 0x1c5   :  { %888 = vmatprep.mubr.bf16.mxu0 %v720_v20 }
 0x1c6   :  { %889 = vmatmul.mubr.bf16.vlgmr.msra.gmra.mxu0 %v719_v21 }
 0x286   :  { %v1143_v22 = vpop.f32.mrf.mxu0 }
 0x288   :  { %v1144_v24 = vpop.f32.mrf.mxu0 }
 0x289   :  { %v1145_v25 = vadd.f32 %v1144_v24, %v1143_v22 }
 0x28a   :  { %v1146_v26 = vpop.f32.mrf.mxu0 }
 0x28b   :  { %v891_v27 = vadd.f32 %v1145_v25, %v1101_v23 }
 0x28c   :  { %v1147_v28 = vpop.f32.mrf.mxu0 }
 0x28d   :  { %v896_v29 = vmax.f32 %v891_v27, 0.0 }
 0x28f   :  { %v897_v30 = vpack.c.bf16 %v896_v29, %v896_v29 }
 0x291   :  { %1175 = vmatmul.mubr.bf16.vlgmr.msra.gmra.mxu1 %v897_v30 }
 0x351   :  { %v1003_v32 = vpop.f32.mrf.mxu1 }
 0x352   :  { %v1004_v33 = vadd.f32 %v1118_v31, %v1003_v32 }
 0x353   :  { %v1176_v34 = vpop.f32.mrf.mxu1 }
 0x354   :  { %1010 = vst.msk [vmem:[#allocation8] sm:$0xff] %vm1009_vm2, %v1004_v33 }
 0x355   :  { %v1006_v35 = vpop.f32.mrf.mxu1 }
 0x356   :  { %1392 = shalt.err (!%p1389_p5)
}
 0x357   :  { %1020 = dma.vmem_to_hbm [thread:$0]  %s1018_s17, 128, %s1563_s9, [#allocation4]   ;;  %v1177_v36 = vpop.f32.mrf.mxu1 }
 0x358   :  { %1405 = dma.done.wait [#allocation4], 128  }
 0x359   :  { %1406 = vsyncadd [#allocation4], 4294967168 }
 0x35a   :  { %1024 = vsyncpa [#allocation3], 1 }
 0x35b   :  { %1025 = vsyncpa [#allocation6], 1 }
 0x35c   :  { %1026 = vsyncpa [#allocation4], 1 }

</bundles_post_ra>
